<compile_context>
chip_gen: v7x
topology: tpu7x:2x2x1
jax: 0.10.0
libtpu: 0.0.40
codegen_flags: <defaults>
</compile_context>

<pallas_src>
import jax
import jax.numpy as jnp
from jax.experimental import pallas as pl
from jax.experimental.pallas import tpu as pltpu


def fused_downsample_conv1x1_kernel(xp_ref, w_ref, b_ref, o_ref):
    # xp_ref : (4*C_in, BL)    phase-expanded activations, lanes = (n, ho, wo)
    # w_ref  : (C_out, 4*C_in) pooling-folded 1x1 conv weight (0.25 * [W W W W])
    # b_ref  : (C_out, 1)      bias (broadcast over lanes)
    # o_ref  : (C_out, BL)     lane-dense output slab
    acc = jnp.dot(w_ref[...], xp_ref[...], preferred_element_type=jnp.float32)
    o_ref[...] = (acc + b_ref[...]).astype(o_ref.dtype)


def downsample_conv2d_forward(x, weight, bias):
    """x: (N, C_in, H, W) NCHW float32 (even H, W).
    weight: (C_out, C_in)  (the squeezed (C_out, C_in, 1, 1) PyTorch kernel).
    bias:   (C_out,)
    Returns (N, C_out, H//2, W//2).
    """
    N, C_in, H, W = x.shape
    C_out = weight.shape[0]
    Ho, Wo = H // 2, W // 2
    S = Ho * Wo
    K4 = 4 * C_in
    LANES = N * S

    # Phase extraction (im2col for the fused 2x2/stride-2 conv): one
    # wrapper-side reshape/transpose so the kernel sees a lane-dense RHS with
    # lanes = (n, ho, wo) and K = (dh, dw, c).
    xp = (x.reshape(N, C_in, Ho, 2, Wo, 2)
            .transpose(3, 5, 1, 0, 2, 4)           # (2, 2, C_in, N, Ho, Wo)
            .reshape(K4, LANES))

    # Fold the 2x2-mean pooling into the 1x1 conv weight: columns ordered
    # (phase-major, channel-minor) to match xp's K ordering.
    w_folded = 0.25 * jnp.tile(weight, (1, 4))      # (C_out, 4*C_in)
    b_col = bias.reshape(C_out, 1)

    # Lane-axis grid blocks.  One step for small problems; split into
    # lane-dense (multiple-of-128) blocks for large ones so the "parallel"
    # axis can shard across v7x's two TensorCores and the activation DMA
    # overlaps compute.
    BL = LANES
    while BL > 1024 and BL % 2 == 0 and (BL // 2) % 128 == 0:
        BL //= 2
    grid = (LANES // BL,)

    out = pl.pallas_call(
        fused_downsample_conv1x1_kernel,
        out_shape=jax.ShapeDtypeStruct((C_out, LANES), x.dtype),
        grid_spec=pltpu.PrefetchScalarGridSpec(
            num_scalar_prefetch=0,
            grid=grid,
            in_specs=[
                pl.BlockSpec((K4, BL), lambda i: (0, i)),
                pl.BlockSpec((C_out, K4), lambda i: (0, 0)),
                pl.BlockSpec((C_out, 1), lambda i: (0, 0)),
            ],
            out_specs=pl.BlockSpec((C_out, BL), lambda i: (0, i)),
        ),
        compiler_params=pltpu.CompilerParams(
            dimension_semantics=("parallel",)),
    )(xp, w_folded, b_col)

    # Back to NCHW in the wrapper (layout plumbing on the 4x-smaller output).
    return out.reshape(C_out, N, Ho, Wo).transpose(1, 0, 2, 3)


def downsample_conv2d_reference(x, weight, bias):
    """Pure-JAX reference (NCHW), even H/W: bilinear x0.5 == 2x2 mean pool."""
    N, C_in, H, W = x.shape
    pooled = x.reshape(N, C_in, H // 2, 2, W // 2, 2).mean(axis=(3, 5))
    out = jnp.einsum('oc,nchw->nohw', weight, pooled)
    return out + bias[None, :, None, None]


if __name__ == "__main__":
    # DownsampleConv2d(in_channels=4, out_channels=8, kernel_size=1)
    N, C_IN, H, W = 2, 4, 16, 16
    C_OUT = 8

    key = jax.random.PRNGKey(0)
    kx, kw, kb = jax.random.split(key, 3)

    x = jax.random.normal(kx, (N, C_IN, H, W), jnp.float32)
    weight = 0.1 * jax.random.normal(kw, (C_OUT, C_IN), jnp.float32)  # 1x1 conv
    bias = 0.1 * jax.random.normal(kb, (C_OUT,), jnp.float32)

    out = downsample_conv2d_forward(x, weight, bias)
    out = jax.block_until_ready(out)

    ref = downsample_conv2d_reference(x, weight, bias)
    assert out.shape == (N, C_OUT, H // 2, W // 2)
    assert jnp.allclose(out, ref, atol=1e-5, rtol=1e-5), float(
        jnp.max(jnp.abs(out - ref)))

    print("KERNEL_OK")
</pallas_src>

<mosaic_0001>
module attributes {stable_mosaic.version = 11 : i64} {
  func.func @fused_downsample_conv1x1_kernel(%arg0: i32, %arg1: memref<16x128xf32, #tpu.memory_space<vmem>>, %arg2: memref<8x16xf32, #tpu.memory_space<vmem>>, %arg3: memref<8x1xf32, #tpu.memory_space<vmem>>, %arg4: memref<8x128xf32, #tpu.memory_space<vmem>>) attributes {dimension_semantics = [#tpu.dimension_semantics<parallel>], iteration_bounds = array<i64: 1>, scalar_prefetch = 0 : i64, scratch_operands = 0 : i64, tpu.core_type = #tpu.core_type<tc>, window_params = [{transform_indices = @transform_0, window_bounds = array<i64: 16, 128>}, {pipeline_mode = #tpu.pipeline_mode<synchronous>, transform_indices = @transform_1, window_bounds = array<i64: 8, 16>}, {pipeline_mode = #tpu.pipeline_mode<synchronous>, transform_indices = @transform_2, window_bounds = array<i64: 8, 1>}, {transform_indices = @transform_3, window_bounds = array<i64: 8, 128>}]} {
    %c0 = arith.constant 0 : index
    %c0_0 = arith.constant 0 : index
    %0 = vector.load %arg2[%c0, %c0_0] : memref<8x16xf32, #tpu.memory_space<vmem>>, vector<8x16xf32>
    %c0_1 = arith.constant 0 : index
    %c0_2 = arith.constant 0 : index
    %1 = vector.load %arg1[%c0_1, %c0_2] : memref<16x128xf32, #tpu.memory_space<vmem>>, vector<16x128xf32>
    %cst = arith.constant dense<0.000000e+00> : vector<8x128xf32>
    %2 = tpu.matmul %0, %1, %cst {dimension_numbers = #tpu.dot_dimension_numbers<[1], [0], [0], [1], [0, 0, 1, 1], [], []>} : vector<8x16xf32>, vector<16x128xf32>, vector<8x128xf32> -> vector<8x128xf32>
    %c0_3 = arith.constant 0 : index
    %c0_4 = arith.constant 0 : index
    %3 = vector.load %arg3[%c0_3, %c0_4] : memref<8x1xf32, #tpu.memory_space<vmem>>, vector<8x1xf32>
    %4 = vector.broadcast %3 : vector<8x1xf32> to vector<8x128xf32>
    %5 = arith.addf %2, %4 : vector<8x128xf32>
    %c0_5 = arith.constant 0 : index
    %c0_6 = arith.constant 0 : index
    %6 = vector.load %arg4[%c0_5, %c0_6] : memref<8x128xf32, #tpu.memory_space<vmem>>, vector<8x128xf32>
    tpu.vector_store %arg4[%c0_5, %c0_6], %5 {strides = array<i32>} : memref<8x128xf32, #tpu.memory_space<vmem>>, vector<8x128xf32>,
    return
  }
  func.func @transform_0(%arg0: i32) -> (i32, i32) {
    %c0_i32 = arith.constant 0 : i32
    %c0_i32_0 = arith.constant 0 : i32
    return %c0_i32, %arg0 : i32, i32
  }
  func.func @transform_1(%arg0: i32) -> (i32, i32) {
    %c0_i32 = arith.constant 0 : i32
    %c0_i32_0 = arith.constant 0 : i32
    %c0_i32_1 = arith.constant 0 : i32
    return %c0_i32, %c0_i32_0 : i32, i32
  }
  func.func @transform_2(%arg0: i32) -> (i32, i32) {
    %c0_i32 = arith.constant 0 : i32
    %c0_i32_0 = arith.constant 0 : i32
    %c0_i32_1 = arith.constant 0 : i32
    return %c0_i32, %c0_i32_0 : i32, i32
  }
  func.func @transform_3(%arg0: i32) -> (i32, i32) {
    %c0_i32 = arith.constant 0 : i32
    %c0_i32_0 = arith.constant 0 : i32
    return %c0_i32, %arg0 : i32, i32
  }
}

</mosaic_0001>

<bundles_post_ra>
// kernel: tpu_custom_call.1
= control target key start
LH: loop header
LB: loop body
LE: loop exit
PB: predicated region body
PF: predicated region fallthrough
CT: control target
= control target key end

     0   :  { %8 = vsyncpa [#allocation3], 0  ;;  %s257_s0 = inlined_call_operand.hbm [shape: f32[16,128], index: 0, kind: input, shape index: {}]   ;;  %s258_s1 = inlined_call_operand.vmem [shape: f32[8,16], index: 1, kind: input, shape index: {}]   ;;  %s259_s2 = inlined_call_operand.vmem [shape: f32[8,1], index: 2, kind: input, shape index: {}]   ;;  %s260_s3 = inlined_call_operand.hbm [shape: f32[8,128], index: 3, kind: output, shape index: {}]  }
   0x1   :  { %9 = vsyncpa [#allocation4], 0  ;;  %s199_s12 = smov [#allocation2]   ;;  %s151_s16 = scalar_lea.hbm %s257_s0, 256 }
   0x2   :  { %s15_s13 = sshll.u32 %s199_s12, 4  ;;  %p152_p0 = scmp.ne.s32.totalorder %s257_s0, %s151_s16  ;;  %s16_s13 = int_to_ptr.vmem [resolvable:$true] %s15_s13 }
   0x3   :  { %p155_p1 = scmp.lt.u32.totalorder %s151_s16, %s257_s0 }
   0x5   :  { %p157_p2 = pnand %p155_p1, %p152_p0 }
   0x7   :  { %160 = shalt.err (!%p157_p2)
}
   0x8   :  { %s161_s21 = scalar_lea.vmem %s16_s13, 256  ;;  %p166_p4 = scmp.lt.s32.totalorder %s16_s13, %s16_s13 }
   0x9   :  { %p162_p3 = scmp.ne.s32.totalorder %s16_s13, %s161_s21  ;;  %p167_p5 = scmp.lt.s32.totalorder %s161_s21, %s161_s21 }
   0xb   :  { %p168_p6 = por %p167_p5, %p166_p4 }
   0xd   :  { %p169_p7 = pnand %p168_p6, %p162_p3 }
   0xf   :  { %172 = shalt.err (!%p169_p7)
}
  0x10   :  { %s200_s22 = smov 128   ;;  %s201_s23 = smov 8  }
  0x11   :  { %21 = dma.hbm_to_vmem [thread:$0]  %s257_s0, 256, %s16_s13, [#allocation3], %s200_s22, %s200_s22, %s201_s23  }
  0x12   :  { %195 = dma.done.wait [#allocation3], 256  }
  0x13   :  { %196 = vsyncadd [#allocation3], 4294967040  ;;  %v202_v0 = vmov 0.0|0.0   ;;  %vm203_vm0 = vmmov 0   ;;  %v204_v1 = vmov 0.0   ;;  %v205_v2 = vmov 0  }
  0x14   :  { %139 = vmatprep.subr.bf16.mxu0 %v202_v0  ;;  %136 = vmatprep.mubr.msk.f32.mxu0 %vm203_vm0, %v204_v1  ;;  %v30_v3 = vld [vmem:[#allocation2] sm:$0xff]  ;;  %v31_v4 = vld [vmem:[#allocation2 + $0x8] sm:$0xff]  ;;  %vm38_vm1 = vcmask 130048   ;;  %s206_s29 = smov [#allocation5]  }
  0x15   :  { %150 = vset.pattern.permute.xlu0 %v205_v2  ;;  %v140_v5 = vpack.c.bf16 %v31_v4, %v30_v3  ;;  %v32_v6 = vld [vmem:[%s259_s2] sm:$0xff]  ;;  %s119_s30 = sshll.u32 %s206_s29, 4  ;;  %s120_s30 = int_to_ptr.vmem [resolvable:$true] %s119_s30 }
  0x16   :  { %35 = vperm.xlu0 %150, %v32_v6   ;;  %v29_v7 = vld [vmem:[%s258_s1] sm:$0xff]  ;;  %s173_s4 = scalar_lea.vmem %s120_s30, 128  ;;  %p178_p9 = scmp.lt.s32.totalorder %s120_s30, %s120_s30 }
  0x17   :  { %141 = vmatpush3.bf16.msra.mxu0 %v140_v5  ;;  %p174_p8 = scmp.ne.s32.totalorder %s120_s30, %s173_s4  ;;  %p179_p10 = scmp.lt.s32.totalorder %s173_s4, %s173_s4 }
  0x19   :  { %p180_p11 = por %p179_p10, %p178_p9 }
  0x1a   :  { %137 = vmatmul.mubr.msk.f32.vlgmr.msra.gmra.mrb[0].mxu0 %vm38_vm1, %v29_v7 }
  0x1b   :  { %p181_p12 = pnand %p180_p11, %p174_p8 }
  0x95   :  { %v36_v8 = vpop.permute.xlu0 %35 }
  0xed   :  { %v108_v9 = vpop.f32.mrb[0].mxu0 }
  0xee   :  { %v109_v10 = vadd.f32 %v108_v9, %v36_v8  ;;  %v138_v11 = vpop.f32.mrb[1].mxu0 }
  0xf0   :  { %112 = vst [vmem:[#allocation5] sm:$0xff] %v109_v10 }
  0xf1   :  { %184 = shalt.err (!%p181_p12)
}
  0xf2   :  { %s185_s1 = scalar_lea.hbm %s260_s3, 128 }
  0xf3   :  { %p186_p13 = scmp.ne.s32.totalorder %s260_s3, %s185_s1  ;;  %p189_p0 = scmp.lt.u32.totalorder %s185_s1, %s260_s3 }
  0xf5   :  { %p191_p1 = pnand %p189_p0, %p186_p13 }
  0xf7   :  { %194 = shalt.err (!%p191_p1)
}
  0xf8   :  { %122 = dma.vmem_to_hbm [thread:$0]  %s120_s30, 128, %s260_s3, [#allocation4]  }
  0xf9   :  { %197 = dma.done.wait [#allocation4], 128  }
  0xfa   :  { %198 = vsyncadd [#allocation4], 4294967168 }
  0xfb   :  { %126 = vsyncpa [#allocation3], 1 }
  0xfc   :  { %127 = vsyncpa [#allocation4], 1 }

</bundles_post_ra>
